<compile_context>
chip_gen: v7x
topology: tpu7x:2x2x1
jax: 0.10.0
libtpu: 0.0.40
codegen_flags: <defaults>
</compile_context>

<pallas_src>
import functools

import jax
import jax.numpy as jnp
from jax import lax
from jax.experimental import pallas as pl
from jax.experimental.pallas import tpu as pltpu


def _round_up(a, m):
    return ((a + m - 1) // m) * m


# ---------------------------------------------------------------------------
# Filter-manifold network (3 tiny dense layers, ReLU after each) — plain JAX.
# Better left to XLA than a dedicated Pallas call (tiny matmuls).
# ---------------------------------------------------------------------------
def manifold_network(z, params):
    h = z.astype(jnp.float32)
    for (w, b) in params:
        h = jnp.maximum(jnp.dot(h, w) + b, 0.0)   # ReLU after every layer (incl. last)
    return h


# ---------------------------------------------------------------------------
# Per-group adaptive conv + bias + ReLU — Pallas kernel (G samples / grid step)
# ---------------------------------------------------------------------------
def _adaptive_conv_kernel(xf_ref, w_ref, b_ref, o_ref, p_ref, *,
                          K, C_in_p, Wp, n_cols, G):
    # xf_ref: (G, C_in_p, L_pad)        bf16 flattened zero-padded NCHW images
    # w_ref : (G, C_out, K*K*C_in_p)    bf16 per-sample weights, (kh, kw, ci) order
    # b_ref : (G, C_out, 1)             f32 per-sample biases
    # o_ref : (G, C_out, n_cols)        f32 lane-dense flat output (junk past H*Wp
    #                                   and in wrap columns; sliced off outside)
    # p_ref : (K*K*C_in_p, n_cols)      bf16 VMEM im2col scratch (reused across g)
    for g in range(G):                                   # static unrolled group loop
        xf = xf_ref[g]                                   # (C_in_p, L_pad) bf16

        # Build the im2col matrix: each tap is a static lane-shifted slice of the
        # flattened padded image. C_in_p = 16 rows => aligned, unmasked bf16 tile
        # stores into the scratch.
        for kh in range(K):
            for kw in range(K):
                tap = kh * K + kw
                s = kh * Wp + kw                          # static flat shift of this tap
                p_ref[tap * C_in_p:(tap + 1) * C_in_p, :] = xf[:, s:s + n_cols]

        # Single MXU matmul (bf16 x bf16 -> f32 accumulator), lane-dense output.
        acc = jnp.dot(w_ref[g], p_ref[...], preferred_element_type=jnp.float32)
        acc = jnp.maximum(acc + b_ref[g], 0.0)            # bias + ReLU in f32
        o_ref[g] = acc.astype(o_ref.dtype)


def adaptive_conv2d(x, z, params, *, channels_in, channels_out, kernel_size,
                    group_size=None):
    """x: (B, C_in, H, W) NCHW, z: (B, features_in). Returns (B, C_out, H, W)."""
    B, c_in, H, W = x.shape
    assert c_in == channels_in
    K = kernel_size
    # 'same' padding as in the reference (p = K // 2) only matches for odd K, stride 1.
    assert K % 2 == 1, "same padding requires an odd kernel size"
    p = K // 2
    Hp, Wp = H + 2 * p, W + 2 * p
    num_kernel = channels_in * channels_out * K * K

    # bf16 packs 16 rows per vreg -> pad C_in so every im2col tap write is a
    # full, unmasked sublane tile. Padded channels carry zero weights.
    C_in_p = _round_up(channels_in, 16)

    # Samples fused per grid step (toy case: whole batch in one step).
    G = min(B, 8) if group_size is None else group_size
    B_pad = _round_up(B, G)

    # Lane-dense output width; taps shift up to s_max lanes past it, so pad
    # enough extra bottom image rows that every tap slice stays in bounds.
    n_cols = _round_up(H * Wp, 128)
    s_max = (K - 1) * Wp + (K - 1)
    extra_rows = max(0, -(-(n_cols + s_max - Hp * Wp) // Wp))   # ceil-div
    Hp_ext = Hp + extra_rows
    L_pad = Hp_ext * Wp

    # 1) Per-sample conv parameters from the filter manifold network (XLA).
    aw = manifold_network(z, params)                                  # (B, num_kernel + C_out)
    w = aw[:, :num_kernel].reshape(B, channels_out, channels_in, K, K)
    w = jnp.transpose(w, (0, 1, 3, 4, 2))                             # (B, C_out, K, K, C_in)
    w = jnp.pad(w, ((0, B_pad - B), (0, 0), (0, 0), (0, 0),
                    (0, C_in_p - channels_in)))                       # zero-fill padded channels
    w = w.reshape(B_pad, channels_out, K * K * C_in_p).astype(jnp.bfloat16)
    bias = jnp.pad(aw[:, num_kernel:].reshape(B, channels_out, 1),
                   ((0, B_pad - B), (0, 0), (0, 0)))                  # (B_pad, C_out, 1) f32

    # 2) Single pad: batch-group + channel + spatial 'same' + extra bottom rows,
    #    then flatten (Hp_ext, Wp) onto the lane axis (no transpose, one HBM copy).
    xf = jnp.pad(x.astype(jnp.bfloat16),
                 ((0, B_pad - B), (0, C_in_p - channels_in),
                  (p, p + extra_rows), (p, p)))                       # (B_pad, C_in_p, Hp_ext, Wp)
    xf = xf.reshape(B_pad, C_in_p, L_pad)

    # 3) Pallas conv kernel, G samples per grid step, per-step weight/bias blocks.
    kernel = functools.partial(_adaptive_conv_kernel, K=K, C_in_p=C_in_p,
                               Wp=Wp, n_cols=n_cols, G=G)
    out_flat = pl.pallas_call(
        kernel,
        out_shape=jax.ShapeDtypeStruct((B_pad, channels_out, n_cols), x.dtype),
        grid=(pl.cdiv(B_pad, G),),
        in_specs=[
            pl.BlockSpec((G, C_in_p, L_pad), lambda i: (i, 0, 0)),
            pl.BlockSpec((G, channels_out, K * K * C_in_p), lambda i: (i, 0, 0)),
            pl.BlockSpec((G, channels_out, 1), lambda i: (i, 0, 0)),
        ],
        out_specs=pl.BlockSpec((G, channels_out, n_cols), lambda i: (i, 0, 0)),
        scratch_shapes=[pltpu.VMEM((K * K * C_in_p, n_cols), jnp.bfloat16)],
        compiler_params=pltpu.CompilerParams(dimension_semantics=("parallel",)),
    )(xf, w, bias)

    # 4) Slice + reshape only (already channel-major NCHW; drops padded samples,
    #    the junk wrap columns and the flat lane padding).
    out = out_flat[:B, :, :H * Wp].reshape(B, channels_out, H, Wp)[:, :, :, :W]
    return out


# ---------------------------------------------------------------------------
# Pure-JAX f32 reference (for correctness check only)
# ---------------------------------------------------------------------------
def reference(x, z, params, channels_in, channels_out, K):
    h = z
    for (w, b) in params:
        h = jnp.maximum(h @ w + b, 0.0)
    aw = h
    B = x.shape[0]
    num_kernel = channels_in * channels_out * K * K
    outs = []
    for b in range(B):
        wb = aw[b, :num_kernel].reshape(channels_out, channels_in, K, K)
        bb = aw[b, num_kernel:]
        ob = lax.conv_general_dilated(
            x[b:b + 1], wb, window_strides=(1, 1), padding="SAME",
            dimension_numbers=("NCHW", "OIHW", "NCHW"))
        ob = jnp.maximum(ob + bb[None, :, None, None], 0.0)
        outs.append(ob)
    return jnp.concatenate(outs, axis=0)


if __name__ == "__main__":
    # Small shapes consistent with the module's example usage.
    B, C_IN, C_OUT, F_IN, K, H, W = 2, 4, 8, 2, 3, 16, 16
    MANIFOLD = [20, 30]
    num_kernel = C_IN * C_OUT * K * K
    num_out = num_kernel + C_OUT

    key = jax.random.PRNGKey(0)

    # Deterministic manifold-network parameters (weights stored as (in, out)).
    dims = [F_IN] + MANIFOLD + [num_out]
    params = []
    for i in range(len(dims) - 1):
        key, k_w, k_b = jax.random.split(key, 3)
        w = jax.random.normal(k_w, (dims[i], dims[i + 1]), jnp.float32) / jnp.sqrt(dims[i])
        b = 0.1 * jax.random.normal(k_b, (1, dims[i + 1]), jnp.float32)
        params.append((w, b))

    key, k_x, k_z = jax.random.split(key, 3)
    x = jax.random.uniform(k_x, (B, C_IN, H, W), jnp.float32)
    z = jax.random.uniform(k_z, (B, F_IN), jnp.float32)

    fwd = jax.jit(functools.partial(adaptive_conv2d,
                                    channels_in=C_IN, channels_out=C_OUT, kernel_size=K))
    out = fwd(x, z, params)
    out = jax.block_until_ready(out)

    ref = reference(x, z, params, C_IN, C_OUT, K)
    assert out.shape == (B, C_OUT, H, W), out.shape
    # Tolerance loosened for the bf16 data path (f32 accumulator kept in-kernel).
    max_ref = float(jnp.max(jnp.abs(ref)))
    max_err = float(jnp.max(jnp.abs(out.astype(jnp.float32) - ref)))
    assert max_err <= 2e-2 * max_ref + 1e-3, (max_err, max_ref)

    print("KERNEL_OK")
</pallas_src>

<mosaic_0001>
module attributes {stable_mosaic.version = 11 : i64} {
  func.func @_adaptive_conv_kernel(%arg0: i32, %arg1: memref<2x16x432xbf16, #tpu.memory_space<vmem>>, %arg2: memref<2x8x144xbf16, #tpu.memory_space<vmem>>, %arg3: memref<2x8x1xf32, #tpu.memory_space<vmem>>, %arg4: memref<2x8x384xf32, #tpu.memory_space<vmem>>, %arg5: memref<144x384xbf16, #tpu.memory_space<vmem>>) attributes {dimension_semantics = [#tpu.dimension_semantics<parallel>], iteration_bounds = array<i64: 1>, scalar_prefetch = 0 : i64, scratch_operands = 1 : i64, tpu.core_type = #tpu.core_type<tc>, window_params = [{transform_indices = @transform_0, window_bounds = array<i64: 2, 16, 432>}, {transform_indices = @transform_1, window_bounds = array<i64: 2, 8, 144>}, {transform_indices = @transform_2, window_bounds = array<i64: 2, 8, 1>}, {transform_indices = @transform_3, window_bounds = array<i64: 2, 8, 384>}]} {
    %c0 = arith.constant 0 : index
    %c0_0 = arith.constant 0 : index
    %c0_1 = arith.constant 0 : index
    %0 = vector.load %arg1[%c0, %c0_0, %c0_1] : memref<2x16x432xbf16, #tpu.memory_space<vmem>>, vector<1x16x432xbf16>
    %1 = vector.shape_cast %0 : vector<1x16x432xbf16> to vector<16x432xbf16>
    %2 = vector.extract_strided_slice %1 {offsets = [0, 0], sizes = [16, 384], strides = [1, 1]} : vector<16x432xbf16> to vector<16x384xbf16>
    %c0_2 = arith.constant 0 : index
    %c0_3 = arith.constant 0 : index
    %3 = vector.load %arg5[%c0_2, %c0_3] : memref<144x384xbf16, #tpu.memory_space<vmem>>, vector<16x384xbf16>
    tpu.vector_store %arg5[%c0_2, %c0_3], %2 {strides = array<i32>} : memref<144x384xbf16, #tpu.memory_space<vmem>>, vector<16x384xbf16>,
    %4 = vector.extract_strided_slice %1 {offsets = [0, 1], sizes = [16, 384], strides = [1, 1]} : vector<16x432xbf16> to vector<16x384xbf16>
    %c16 = arith.constant 16 : index
    %c0_4 = arith.constant 0 : index
    %5 = vector.load %arg5[%c16, %c0_4] : memref<144x384xbf16, #tpu.memory_space<vmem>>, vector<16x384xbf16>
    tpu.vector_store %arg5[%c16, %c0_4], %4 {strides = array<i32>} : memref<144x384xbf16, #tpu.memory_space<vmem>>, vector<16x384xbf16>,
    %6 = vector.extract_strided_slice %1 {offsets = [0, 2], sizes = [16, 384], strides = [1, 1]} : vector<16x432xbf16> to vector<16x384xbf16>
    %c32 = arith.constant 32 : index
    %c0_5 = arith.constant 0 : index
    %7 = vector.load %arg5[%c32, %c0_5] : memref<144x384xbf16, #tpu.memory_space<vmem>>, vector<16x384xbf16>
    tpu.vector_store %arg5[%c32, %c0_5], %6 {strides = array<i32>} : memref<144x384xbf16, #tpu.memory_space<vmem>>, vector<16x384xbf16>,
    %8 = vector.extract_strided_slice %1 {offsets = [0, 18], sizes = [16, 384], strides = [1, 1]} : vector<16x432xbf16> to vector<16x384xbf16>
    %c48 = arith.constant 48 : index
    %c0_6 = arith.constant 0 : index
    %9 = vector.load %arg5[%c48, %c0_6] : memref<144x384xbf16, #tpu.memory_space<vmem>>, vector<16x384xbf16>
    tpu.vector_store %arg5[%c48, %c0_6], %8 {strides = array<i32>} : memref<144x384xbf16, #tpu.memory_space<vmem>>, vector<16x384xbf16>,
    %10 = vector.extract_strided_slice %1 {offsets = [0, 19], sizes = [16, 384], strides = [1, 1]} : vector<16x432xbf16> to vector<16x384xbf16>
    %c64 = arith.constant 64 : index
    %c0_7 = arith.constant 0 : index
    %11 = vector.load %arg5[%c64, %c0_7] : memref<144x384xbf16, #tpu.memory_space<vmem>>, vector<16x384xbf16>
    tpu.vector_store %arg5[%c64, %c0_7], %10 {strides = array<i32>} : memref<144x384xbf16, #tpu.memory_space<vmem>>, vector<16x384xbf16>,
    %12 = vector.extract_strided_slice %1 {offsets = [0, 20], sizes = [16, 384], strides = [1, 1]} : vector<16x432xbf16> to vector<16x384xbf16>
    %c80 = arith.constant 80 : index
    %c0_8 = arith.constant 0 : index
    %13 = vector.load %arg5[%c80, %c0_8] : memref<144x384xbf16, #tpu.memory_space<vmem>>, vector<16x384xbf16>
    tpu.vector_store %arg5[%c80, %c0_8], %12 {strides = array<i32>} : memref<144x384xbf16, #tpu.memory_space<vmem>>, vector<16x384xbf16>,
    %14 = vector.extract_strided_slice %1 {offsets = [0, 36], sizes = [16, 384], strides = [1, 1]} : vector<16x432xbf16> to vector<16x384xbf16>
    %c96 = arith.constant 96 : index
    %c0_9 = arith.constant 0 : index
    %15 = vector.load %arg5[%c96, %c0_9] : memref<144x384xbf16, #tpu.memory_space<vmem>>, vector<16x384xbf16>
    tpu.vector_store %arg5[%c96, %c0_9], %14 {strides = array<i32>} : memref<144x384xbf16, #tpu.memory_space<vmem>>, vector<16x384xbf16>,
    %16 = vector.extract_strided_slice %1 {offsets = [0, 37], sizes = [16, 384], strides = [1, 1]} : vector<16x432xbf16> to vector<16x384xbf16>
    %c112 = arith.constant 112 : index
    %c0_10 = arith.constant 0 : index
    %17 = vector.load %arg5[%c112, %c0_10] : memref<144x384xbf16, #tpu.memory_space<vmem>>, vector<16x384xbf16>
    tpu.vector_store %arg5[%c112, %c0_10], %16 {strides = array<i32>} : memref<144x384xbf16, #tpu.memory_space<vmem>>, vector<16x384xbf16>,
    %18 = vector.extract_strided_slice %1 {offsets = [0, 38], sizes = [16, 384], strides = [1, 1]} : vector<16x432xbf16> to vector<16x384xbf16>
    %c128 = arith.constant 128 : index
    %c0_11 = arith.constant 0 : index
    %19 = vector.load %arg5[%c128, %c0_11] : memref<144x384xbf16, #tpu.memory_space<vmem>>, vector<16x384xbf16>
    tpu.vector_store %arg5[%c128, %c0_11], %18 {strides = array<i32>} : memref<144x384xbf16, #tpu.memory_space<vmem>>, vector<16x384xbf16>,
    %c0_12 = arith.constant 0 : index
    %c0_13 = arith.constant 0 : index
    %c0_14 = arith.constant 0 : index
    %20 = vector.load %arg2[%c0_12, %c0_13, %c0_14] : memref<2x8x144xbf16, #tpu.memory_space<vmem>>, vector<1x8x144xbf16>
    %21 = vector.shape_cast %20 : vector<1x8x144xbf16> to vector<8x144xbf16>
    %c0_15 = arith.constant 0 : index
    %c0_16 = arith.constant 0 : index
    %22 = vector.load %arg5[%c0_15, %c0_16] : memref<144x384xbf16, #tpu.memory_space<vmem>>, vector<144x384xbf16>
    %cst = arith.constant dense<0.000000e+00> : vector<8x384xf32>
    %23 = tpu.matmul %21, %22, %cst {dimension_numbers = #tpu.dot_dimension_numbers<[1], [0], [0], [1], [0, 0, 1, 1], [], []>} : vector<8x144xbf16>, vector<144x384xbf16>, vector<8x384xf32> -> vector<8x384xf32>
    %c0_17 = arith.constant 0 : index
    %c0_18 = arith.constant 0 : index
    %c0_19 = arith.constant 0 : index
    %24 = vector.load %arg3[%c0_17, %c0_18, %c0_19] : memref<2x8x1xf32, #tpu.memory_space<vmem>>, vector<1x8x1xf32>
    %25 = vector.shape_cast %24 : vector<1x8x1xf32> to vector<8x1xf32>
    %26 = vector.broadcast %25 : vector<8x1xf32> to vector<8x384xf32>
    %27 = arith.addf %23, %26 : vector<8x384xf32>
    %cst_20 = arith.constant 0.000000e+00 : f32
    %28 = vector.broadcast %cst_20 : f32 to vector<8x384xf32>
    %29 = arith.maximumf %27, %28 : vector<8x384xf32>
    %c0_21 = arith.constant 0 : index
    %c0_22 = arith.constant 0 : index
    %c0_23 = arith.constant 0 : index
    %30 = vector.load %arg4[%c0_21, %c0_22, %c0_23] : memref<2x8x384xf32, #tpu.memory_space<vmem>>, vector<1x8x384xf32>
    %31 = vector.shape_cast %30 : vector<1x8x384xf32> to vector<8x384xf32>
    %32 = vector.shape_cast %29 : vector<8x384xf32> to vector<1x8x384xf32>
    tpu.vector_store %arg4[%c0_21, %c0_22, %c0_23], %32 {strides = array<i32>} : memref<2x8x384xf32, #tpu.memory_space<vmem>>, vector<1x8x384xf32>,
    %c1 = arith.constant 1 : index
    %c0_24 = arith.constant 0 : index
    %c0_25 = arith.constant 0 : index
    %33 = vector.load %arg1[%c1, %c0_24, %c0_25] : memref<2x16x432xbf16, #tpu.memory_space<vmem>>, vector<1x16x432xbf16>
    %34 = vector.shape_cast %33 : vector<1x16x432xbf16> to vector<16x432xbf16>
    %35 = vector.extract_strided_slice %34 {offsets = [0, 0], sizes = [16, 384], strides = [1, 1]} : vector<16x432xbf16> to vector<16x384xbf16>
    %c0_26 = arith.constant 0 : index
    %c0_27 = arith.constant 0 : index
    %36 = vector.load %arg5[%c0_26, %c0_27] : memref<144x384xbf16, #tpu.memory_space<vmem>>, vector<16x384xbf16>
    tpu.vector_store %arg5[%c0_26, %c0_27], %35 {strides = array<i32>} : memref<144x384xbf16, #tpu.memory_space<vmem>>, vector<16x384xbf16>,
    %37 = vector.extract_strided_slice %34 {offsets = [0, 1], sizes = [16, 384], strides = [1, 1]} : vector<16x432xbf16> to vector<16x384xbf16>
    %c16_28 = arith.constant 16 : index
    %c0_29 = arith.constant 0 : index
    %38 = vector.load %arg5[%c16_28, %c0_29] : memref<144x384xbf16, #tpu.memory_space<vmem>>, vector<16x384xbf16>
    tpu.vector_store %arg5[%c16_28, %c0_29], %37 {strides = array<i32>} : memref<144x384xbf16, #tpu.memory_space<vmem>>, vector<16x384xbf16>,
    %39 = vector.extract_strided_slice %34 {offsets = [0, 2], sizes = [16, 384], strides = [1, 1]} : vector<16x432xbf16> to vector<16x384xbf16>
    %c32_30 = arith.constant 32 : index
    %c0_31 = arith.constant 0 : index
    %40 = vector.load %arg5[%c32_30, %c0_31] : memref<144x384xbf16, #tpu.memory_space<vmem>>, vector<16x384xbf16>
    tpu.vector_store %arg5[%c32_30, %c0_31], %39 {strides = array<i32>} : memref<144x384xbf16, #tpu.memory_space<vmem>>, vector<16x384xbf16>,
    %41 = vector.extract_strided_slice %34 {offsets = [0, 18], sizes = [16, 384], strides = [1, 1]} : vector<16x432xbf16> to vector<16x384xbf16>
    %c48_32 = arith.constant 48 : index
    %c0_33 = arith.constant 0 : index
    %42 = vector.load %arg5[%c48_32, %c0_33] : memref<144x384xbf16, #tpu.memory_space<vmem>>, vector<16x384xbf16>
    tpu.vector_store %arg5[%c48_32, %c0_33], %41 {strides = array<i32>} : memref<144x384xbf16, #tpu.memory_space<vmem>>, vector<16x384xbf16>,
    %43 = vector.extract_strided_slice %34 {offsets = [0, 19], sizes = [16, 384], strides = [1, 1]} : vector<16x432xbf16> to vector<16x384xbf16>
    %c64_34 = arith.constant 64 : index
    %c0_35 = arith.constant 0 : index
    %44 = vector.load %arg5[%c64_34, %c0_35] : memref<144x384xbf16, #tpu.memory_space<vmem>>, vector<16x384xbf16>
    tpu.vector_store %arg5[%c64_34, %c0_35], %43 {strides = array<i32>} : memref<144x384xbf16, #tpu.memory_space<vmem>>, vector<16x384xbf16>,
    %45 = vector.extract_strided_slice %34 {offsets = [0, 20], sizes = [16, 384], strides = [1, 1]} : vector<16x432xbf16> to vector<16x384xbf16>
    %c80_36 = arith.constant 80 : index
    %c0_37 = arith.constant 0 : index
    %46 = vector.load %arg5[%c80_36, %c0_37] : memref<144x384xbf16, #tpu.memory_space<vmem>>, vector<16x384xbf16>
    tpu.vector_store %arg5[%c80_36, %c0_37], %45 {strides = array<i32>} : memref<144x384xbf16, #tpu.memory_space<vmem>>, vector<16x384xbf16>,
    %47 = vector.extract_strided_slice %34 {offsets = [0, 36], sizes = [16, 384], strides = [1, 1]} : vector<16x432xbf16> to vector<16x384xbf16>
    %c96_38 = arith.constant 96 : index
    %c0_39 = arith.constant 0 : index
    %48 = vector.load %arg5[%c96_38, %c0_39] : memref<144x384xbf16, #tpu.memory_space<vmem>>, vector<16x384xbf16>
    tpu.vector_store %arg5[%c96_38, %c0_39], %47 {strides = array<i32>} : memref<144x384xbf16, #tpu.memory_space<vmem>>, vector<16x384xbf16>,
    %49 = vector.extract_strided_slice %34 {offsets = [0, 37], sizes = [16, 384], strides = [1, 1]} : vector<16x432xbf16> to vector<16x384xbf16>
    %c112_40 = arith.constant 112 : index
    %c0_41 = arith.constant 0 : index
    %50 = vector.load %arg5[%c112_40, %c0_41] : memref<144x384xbf16, #tpu.memory_space<vmem>>, vector<16x384xbf16>
    tpu.vector_store %arg5[%c112_40, %c0_41], %49 {strides = array<i32>} : memref<144x384xbf16, #tpu.memory_space<vmem>>, vector<16x384xbf16>,
    %51 = vector.extract_strided_slice %34 {offsets = [0, 38], sizes = [16, 384], strides = [1, 1]} : vector<16x432xbf16> to vector<16x384xbf16>
    %c128_42 = arith.constant 128 : index
    %c0_43 = arith.constant 0 : index
    %52 = vector.load %arg5[%c128_42, %c0_43] : memref<144x384xbf16, #tpu.memory_space<vmem>>, vector<16x384xbf16>
    tpu.vector_store %arg5[%c128_42, %c0_43], %51 {strides = array<i32>} : memref<144x384xbf16, #tpu.memory_space<vmem>>, vector<16x384xbf16>,
    %c1_44 = arith.constant 1 : index
    %c0_45 = arith.constant 0 : index
    %c0_46 = arith.constant 0 : index
    %53 = vector.load %arg2[%c1_44, %c0_45, %c0_46] : memref<2x8x144xbf16, #tpu.memory_space<vmem>>, vector<1x8x144xbf16>
    %54 = vector.shape_cast %53 : vector<1x8x144xbf16> to vector<8x144xbf16>
    %c0_47 = arith.constant 0 : index
    %c0_48 = arith.constant 0 : index
    %55 = vector.load %arg5[%c0_47, %c0_48] : memref<144x384xbf16, #tpu.memory_space<vmem>>, vector<144x384xbf16>
    %cst_49 = arith.constant dense<0.000000e+00> : vector<8x384xf32>
    %56 = tpu.matmul %54, %55, %cst_49 {dimension_numbers = #tpu.dot_dimension_numbers<[1], [0], [0], [1], [0, 0, 1, 1], [], []>} : vector<8x144xbf16>, vector<144x384xbf16>, vector<8x384xf32> -> vector<8x384xf32>
    %c1_50 = arith.constant 1 : index
    %c0_51 = arith.constant 0 : index
    %c0_52 = arith.constant 0 : index
    %57 = vector.load %arg3[%c1_50, %c0_51, %c0_52] : memref<2x8x1xf32, #tpu.memory_space<vmem>>, vector<1x8x1xf32>
    %58 = vector.shape_cast %57 : vector<1x8x1xf32> to vector<8x1xf32>
    %59 = vector.broadcast %58 : vector<8x1xf32> to vector<8x384xf32>
    %60 = arith.addf %56, %59 : vector<8x384xf32>
    %cst_53 = arith.constant 0.000000e+00 : f32
    %61 = vector.broadcast %cst_53 : f32 to vector<8x384xf32>
    %62 = arith.maximumf %60, %61 : vector<8x384xf32>
    %c1_54 = arith.constant 1 : index
    %c0_55 = arith.constant 0 : index
    %c0_56 = arith.constant 0 : index
    %63 = vector.load %arg4[%c1_54, %c0_55, %c0_56] : memref<2x8x384xf32, #tpu.memory_space<vmem>>, vector<1x8x384xf32>
    %64 = vector.shape_cast %63 : vector<1x8x384xf32> to vector<8x384xf32>
    %65 = vector.shape_cast %62 : vector<8x384xf32> to vector<1x8x384xf32>
    tpu.vector_store %arg4[%c1_54, %c0_55, %c0_56], %65 {strides = array<i32>} : memref<2x8x384xf32, #tpu.memory_space<vmem>>, vector<1x8x384xf32>,
    return
  }
  func.func @transform_0(%arg0: i32) -> (i32, i32, i32) {
    %c0_i32 = arith.constant 0 : i32
    %c0_i32_0 = arith.constant 0 : i32
    %c0_i32_1 = arith.constant 0 : i32
    return %arg0, %c0_i32, %c0_i32_0 : i32, i32, i32
  }
  func.func @transform_1(%arg0: i32) -> (i32, i32, i32) {
    %c0_i32 = arith.constant 0 : i32
    %c0_i32_0 = arith.constant 0 : i32
    %c0_i32_1 = arith.constant 0 : i32
    return %arg0, %c0_i32, %c0_i32_0 : i32, i32, i32
  }
  func.func @transform_2(%arg0: i32) -> (i32, i32, i32) {
    %c0_i32 = arith.constant 0 : i32
    %c0_i32_0 = arith.constant 0 : i32
    %c0_i32_1 = arith.constant 0 : i32
    return %arg0, %c0_i32, %c0_i32_0 : i32, i32, i32
  }
  func.func @transform_3(%arg0: i32) -> (i32, i32, i32) {
    %c0_i32 = arith.constant 0 : i32
    %c0_i32_0 = arith.constant 0 : i32
    %c0_i32_1 = arith.constant 0 : i32
    return %arg0, %c0_i32, %c0_i32_0 : i32, i32, i32
  }
}

</mosaic_0001>

<bundles_post_ra>
// kernel: adaptive_conv2d.1
= control target key start
LH: loop header
LB: loop body
LE: loop exit
PB: predicated region body
PF: predicated region fallthrough
CT: control target
= control target key end

     0   :  { %v668_v1 = vmov 0   ;;  %s669_s16 = smov 127   ;;  %s670_s21 = smov 126   ;;  %vm225_vm0 = vcmask 130048   ;;  %vm49_vm1 = vcmask 1039360   ;;  %vm67_vm2 = vcmask 1031168   ;;  %s932_s0 = inlined_call_operand.vmem [shape: bf16[2,16,432], index: 0, kind: input, shape index: {}]   ;;  %s933_s1 = inlined_call_operand.vmem [shape: bf16[2,8,144], index: 1, kind: input, shape index: {}]   ;;  %s934_s2 = inlined_call_operand.vmem [shape: f32[2,8,1], index: 2, kind: input, shape index: {}]   ;;  %s935_s3 = inlined_call_operand.vmem [shape: f32[2,8,384], index: 3, kind: output, shape index: {}]  }
   0x1   :  { %v652_v0 = vld [vmem:[%s932_s0 + $0x4] ss:$16 sps:$4 sm:$0xff]   ;;  %270 = vmatprep.subr.bf16.mxu1 %v668_v1  ;;  %650 = vset.pattern.permute.xlu0 %v668_v1  ;;  %v654_v2 = vld [vmem:[%s932_s0] ss:$16 sps:$4 sm:$0xff]   ;;  %v655_v3 = vld [vmem:[%s932_s0 + $0x8] ss:$16 sps:$4 sm:$0xff]  }
   0x2   :  { %651 = vset.pattern.permute.xlu1 %v668_v1  ;;  %43 = vrot.lane.b32.xlu0 %v652_v0, %s669_s16  ;;  %v657_v4 = vld [vmem:[%s932_s0 + $0xc] ss:$16 sps:$4 sm:$0xff]   ;;  %s671_s22 = smov 110   ;;  %s672_s23 = smov 109   ;;  %v742_v5 = vld [vmem:[%s933_s1] sm:$0xff]  ;;  %vm85_vm3 = vcmask 900096  }
   0x3   :  { %229 = vmatprep.subr.bf16.mxu0 %v652_v0  ;;  %41 = vrot.lane.b32.xlu1 %v654_v2, %s669_s16  ;;  %s673_s24 = smov 108   ;;  %s674_s25 = smov 92   ;;  %v621_v6 = vcombine.high %v742_v5, %v742_v5  ;;  %v756_v7 = vld [vmem:[%s932_s0 + $0x24] ss:$16 sps:$4 sm:$0xff]   ;;  %v762_v8 = vld [vmem:[%s932_s0 + $0x28] ss:$16 sps:$4 sm:$0xff]  }
   0x4   :  { %230 = vmatpush1.bf16.msra.mxu0 %v654_v2  ;;  %271 = vmatpush1.bf16.msra.mxu1 %v655_v3  ;;  %s675_s26 = smov 91   ;;  %s676_s29 = smov 90   ;;  %v769_v9 = vld [vmem:[%s932_s0 + $0x20] ss:$16 sps:$4 sm:$0xff]   ;;  %v663_v10 = vld [vmem:[%s932_s0 + $0x2c] ss:$16 sps:$4 sm:$0xff]  }
   0x5   :  { %272 = vmatprep.subr.bf16.mxu1 %v668_v1  ;;  %622 = vmatprep.mubr.msk.bf16.mxu0 %vm225_vm0, %v621_v6  ;;  %v213_v21 = vld [vmem:[%s934_s2] sm:$0xff]  ;;  %v633_v23 = vld [vmem:[%s934_s2 + $0x8] sm:$0xff]  ;;  %vm103_vm4 = vcmask 891904   ;;  %vm121_vm5 = vcmask 883712   ;;  %vm139_vm6 = vcmask 752640   ;;  %vm157_vm7 = vcmask 744448  }
   0x6   :  { %45 = vrot.lane.b32.xlu0 %v655_v3, %s669_s16  ;;  %623 = vmatprep.mubr.msk.bf16.mxu1 %vm225_vm0, %v621_v6  ;;  %vm175_vm8 = vcmask 736256   ;;  %v620_v6 = vcombine.low %v742_v5, %v742_v5 }
   0x7   :  { %47 = vrot.lane.b32.xlu1 %v657_v4, %s669_s16 }
   0xa   :  { %61 = vrot.lane.b32.xlu0 %v652_v0, %s670_s21 }
   0xb   :  { %63 = vrot.lane.b32.xlu1 %v655_v3, %s670_s21 }
   0xe   :  { %59 = vrot.lane.b32.xlu0 %v654_v2, %s670_s21 }
   0xf   :  { %65 = vrot.lane.b32.xlu1 %v657_v4, %s670_s21 }
  0x12   :  { %79 = vrot.lane.b32.xlu0 %v652_v0, %s671_s22 }
  0x13   :  { %81 = vrot.lane.b32.xlu1 %v655_v3, %s671_s22 }
  0x16   :  { %77 = vrot.lane.b32.xlu0 %v654_v2, %s671_s22 }
  0x17   :  { %83 = vrot.lane.b32.xlu1 %v657_v4, %s671_s22 }
  0x1a   :  { %97 = vrot.lane.b32.xlu0 %v652_v0, %s672_s23 }
  0x1b   :  { %99 = vrot.lane.b32.xlu1 %v655_v3, %s672_s23 }
  0x1e   :  { %95 = vrot.lane.b32.xlu0 %v654_v2, %s672_s23 }
  0x1f   :  { %101 = vrot.lane.b32.xlu1 %v657_v4, %s672_s23 }
  0x22   :  { %115 = vrot.lane.b32.xlu0 %v652_v0, %s673_s24 }
  0x23   :  { %117 = vrot.lane.b32.xlu1 %v655_v3, %s673_s24 }
  0x26   :  { %113 = vrot.lane.b32.xlu0 %v654_v2, %s673_s24 }
  0x27   :  { %119 = vrot.lane.b32.xlu1 %v657_v4, %s673_s24 }
  0x2a   :  { %133 = vrot.lane.b32.xlu0 %v652_v0, %s674_s25 }
  0x2b   :  { %135 = vrot.lane.b32.xlu1 %v655_v3, %s674_s25 }
  0x2e   :  { %131 = vrot.lane.b32.xlu0 %v654_v2, %s674_s25 }
  0x2f   :  { %137 = vrot.lane.b32.xlu1 %v657_v4, %s674_s25 }
  0x32   :  { %151 = vrot.lane.b32.xlu0 %v652_v0, %s675_s26 }
  0x33   :  { %153 = vrot.lane.b32.xlu1 %v655_v3, %s675_s26 }
  0x36   :  { %149 = vrot.lane.b32.xlu0 %v654_v2, %s675_s26 }
  0x37   :  { %155 = vrot.lane.b32.xlu1 %v657_v4, %s675_s26 }
  0x3a   :  { %169 = vrot.lane.b32.xlu0 %v652_v0, %s676_s29 }
  0x3b   :  { %171 = vrot.lane.b32.xlu1 %v655_v3, %s676_s29 }
  0x3e   :  { %167 = vrot.lane.b32.xlu0 %v654_v2, %s676_s29 }
  0x3f   :  { %173 = vrot.lane.b32.xlu1 %v657_v4, %s676_s29 }
  0x42   :  { %345 = vrot.lane.b32.xlu0 %v756_v7, %s669_s16 }
  0x43   :  { %347 = vrot.lane.b32.xlu1 %v762_v8, %s669_s16 }
  0x46   :  { %343 = vrot.lane.b32.xlu0 %v769_v9, %s669_s16 }
  0x47   :  { %349 = vrot.lane.b32.xlu1 %v663_v10, %s669_s16 }
  0x4a   :  { %362 = vrot.lane.b32.xlu0 %v756_v7, %s670_s21 }
  0x4b   :  { %364 = vrot.lane.b32.xlu1 %v762_v8, %s670_s21 }
  0x4e   :  { %360 = vrot.lane.b32.xlu0 %v769_v9, %s670_s21 }
  0x4f   :  { %366 = vrot.lane.b32.xlu1 %v663_v10, %s670_s21 }
  0x52   :  { %379 = vrot.lane.b32.xlu0 %v756_v7, %s671_s22 }
  0x53   :  { %381 = vrot.lane.b32.xlu1 %v762_v8, %s671_s22 }
  0x56   :  { %377 = vrot.lane.b32.xlu0 %v769_v9, %s671_s22 }
  0x57   :  { %383 = vrot.lane.b32.xlu1 %v663_v10, %s671_s22 }
  0x5a   :  { %396 = vrot.lane.b32.xlu0 %v756_v7, %s672_s23 }
  0x5b   :  { %398 = vrot.lane.b32.xlu1 %v762_v8, %s672_s23 }
  0x5e   :  { %394 = vrot.lane.b32.xlu0 %v769_v9, %s672_s23 }
  0x5f   :  { %400 = vrot.lane.b32.xlu1 %v663_v10, %s672_s23 }
  0x62   :  { %413 = vrot.lane.b32.xlu0 %v756_v7, %s673_s24 }
  0x63   :  { %415 = vrot.lane.b32.xlu1 %v762_v8, %s673_s24 }
  0x66   :  { %411 = vrot.lane.b32.xlu0 %v769_v9, %s673_s24 }
  0x67   :  { %417 = vrot.lane.b32.xlu1 %v663_v10, %s673_s24 }
  0x6a   :  { %430 = vrot.lane.b32.xlu0 %v756_v7, %s674_s25 }
  0x6b   :  { %432 = vrot.lane.b32.xlu1 %v762_v8, %s674_s25 }
  0x6e   :  { %428 = vrot.lane.b32.xlu0 %v769_v9, %s674_s25 }
  0x6f   :  { %434 = vrot.lane.b32.xlu1 %v663_v10, %s674_s25 }
  0x72   :  { %447 = vrot.lane.b32.xlu0 %v756_v7, %s675_s26 }
  0x73   :  { %449 = vrot.lane.b32.xlu1 %v762_v8, %s675_s26 }
  0x74   :  { %v44_v11 = vpop.permute.xlu0 %43 }
  0x75   :  { %v42_v12 = vpop.permute.xlu1 %41 }
  0x76   :  { %445 = vrot.lane.b32.xlu0 %v769_v9, %s675_s26  ;;  %v50_v17 = vsel %vm49_vm1, %v42_v12, %v44_v11 }
  0x77   :  { %451 = vrot.lane.b32.xlu1 %v663_v10, %s675_s26 }
  0x78   :  { %v46_v13 = vpop.permute.xlu0 %45 }
  0x79   :  { %v48_v14 = vpop.permute.xlu1 %47  ;;  %v51_v15 = vsel %vm49_vm1, %v44_v11, %v46_v13 }
  0x7a   :  { %464 = vrot.lane.b32.xlu0 %v756_v7, %s676_s29  ;;  %231 = vmatprep.subr.bf16.mxu0 %v51_v15  ;;  %v52_v16 = vsel %vm49_vm1, %v46_v13, %v48_v14 }
  0x7b   :  { %466 = vrot.lane.b32.xlu1 %v762_v8, %s676_s29  ;;  %273 = vmatpush1.bf16.msra.mxu1 %v52_v16 }
  0x7c   :  { %232 = vmatpush1.bf16.msra.mxu0 %v50_v17  ;;  %v62_v18 = vpop.permute.xlu0 %61  ;;  %274 = vmatprep.subr.bf16.mxu1 %v668_v1 }
  0x7d   :  { %v64_v19 = vpop.permute.xlu1 %63 }
  0x7e   :  { %462 = vrot.lane.b32.xlu0 %v769_v9, %s676_s29  ;;  %v69_v20 = vsel %vm67_vm2, %v62_v18, %v64_v19 }
  0x7f   :  { %468 = vrot.lane.b32.xlu1 %v663_v10, %s676_s29  ;;  %233 = vmatprep.subr.bf16.mxu0 %v69_v20  ;;  %v869_v10 = vld [vmem:[%s933_s1 + $0x8] sm:$0xff] }
  0x80   :  { %v60_v22 = vpop.permute.xlu0 %59  ;;  %v635_v13 = vcombine.high %v869_v10, %v869_v10 }
  0x81   :  { %v66_v24 = vpop.permute.xlu1 %65  ;;  %v68_v25 = vsel %vm67_vm2, %v60_v22, %v62_v18 }
  0x82   :  { %234 = vmatpush1.bf16.msra.mxu0 %v68_v25  ;;  %v70_v26 = vsel %vm67_vm2, %v64_v19, %v66_v24  ;;  %216 = vperm.xlu0 %650, %v213_v21  }
  0x83   :  { %275 = vmatpush1.bf16.msra.mxu1 %v70_v26  ;;  %512 = vperm.xlu1 %651, %v633_v23  }
  0x84   :  { %v80_v27 = vpop.permute.xlu0 %79  ;;  %276 = vmatprep.subr.bf16.mxu1 %v668_v1 }
  0x85   :  { %v82_v28 = vpop.permute.xlu1 %81 }
  0x86   :  { %v87_v29 = vsel %vm85_vm3, %v80_v27, %v82_v28 }
  0x87   :  { %235 = vmatprep.subr.bf16.mxu0 %v87_v29 }
  0x88   :  { %v78_v30 = vpop.permute.xlu0 %77 }
  0x89   :  { %v84_v31 = vpop.permute.xlu1 %83  ;;  %v86_v32 = vsel %vm85_vm3, %v78_v30, %v80_v27 }
  0x8a   :  { %236 = vmatpush1.bf16.msra.mxu0 %v86_v32  ;;  %v88_v33 = vsel %vm85_vm3, %v82_v28, %v84_v31 }
  0x8b   :  { %277 = vmatpush1.bf16.msra.mxu1 %v88_v33 }
  0x8c   :  { %v98_v34 = vpop.permute.xlu0 %97  ;;  %278 = vmatprep.subr.bf16.mxu1 %v668_v1 }
  0x8d   :  { %v100_v35 = vpop.permute.xlu1 %99 }
  0x8e   :  { %v105_v36 = vsel %vm103_vm4, %v98_v34, %v100_v35 }
  0x8f   :  { %237 = vmatprep.subr.bf16.mxu0 %v105_v36 }
  0x90   :  { %v96_v37 = vpop.permute.xlu0 %95 }
  0x91   :  { %v102_v38 = vpop.permute.xlu1 %101  ;;  %v104_v39 = vsel %vm103_vm4, %v96_v37, %v98_v34 }
  0x92   :  { %238 = vmatpush1.bf16.msra.mxu0 %v104_v39  ;;  %v106_v40 = vsel %vm103_vm4, %v100_v35, %v102_v38 }
  0x93   :  { %279 = vmatpush1.bf16.msra.mxu1 %v106_v40 }
  0x94   :  { %v116_v41 = vpop.permute.xlu0 %115  ;;  %280 = vmatprep.subr.bf16.mxu1 %v668_v1 }
  0x95   :  { %v118_v42 = vpop.permute.xlu1 %117 }
  0x96   :  { %v123_v43 = vsel %vm121_vm5, %v116_v41, %v118_v42 }
  0x97   :  { %239 = vmatprep.subr.bf16.mxu0 %v123_v43 }
  0x98   :  { %v114_v44 = vpop.permute.xlu0 %113 }
  0x99   :  { %v120_v45 = vpop.permute.xlu1 %119  ;;  %v122_v46 = vsel %vm121_vm5, %v114_v44, %v116_v41 }
  0x9a   :  { %240 = vmatpush1.bf16.msra.mxu0 %v122_v46  ;;  %v124_v47 = vsel %vm121_vm5, %v118_v42, %v120_v45 }
  0x9b   :  { %281 = vmatpush1.bf16.msra.mxu1 %v124_v47 }
  0x9c   :  { %v134_v48 = vpop.permute.xlu0 %133  ;;  %282 = vmatprep.subr.bf16.mxu1 %v668_v1 }
  0x9d   :  { %v136_v49 = vpop.permute.xlu1 %135 }
  0x9e   :  { %v141_v50 = vsel %vm139_vm6, %v134_v48, %v136_v49 }
  0x9f   :  { %241 = vmatprep.subr.bf16.mxu0 %v141_v50 }
  0xa0   :  { %v132_v51 = vpop.permute.xlu0 %131 }
  0xa1   :  { %v138_v52 = vpop.permute.xlu1 %137  ;;  %v140_v53 = vsel %vm139_vm6, %v132_v51, %v134_v48 }
  0xa2   :  { %242 = vmatpush1.bf16.msra.mxu0 %v140_v53  ;;  %v142_v54 = vsel %vm139_vm6, %v136_v49, %v138_v52 }
  0xa3   :  { %283 = vmatpush1.bf16.msra.mxu1 %v142_v54 }
  0xa4   :  { %v152_v55 = vpop.permute.xlu0 %151  ;;  %284 = vmatprep.subr.bf16.mxu1 %v668_v1 }
  0xa5   :  { %v154_v56 = vpop.permute.xlu1 %153 }
  0xa6   :  { %v159_v57 = vsel %vm157_vm7, %v152_v55, %v154_v56 }
  0xa7   :  { %243 = vmatprep.subr.bf16.mxu0 %v159_v57 }
  0xa8   :  { %v150_v58 = vpop.permute.xlu0 %149 }
  0xa9   :  { %v156_v59 = vpop.permute.xlu1 %155  ;;  %v158_v60 = vsel %vm157_vm7, %v150_v58, %v152_v55 }
  0xaa   :  { %244 = vmatpush1.bf16.msra.mxu0 %v158_v60  ;;  %v160_v61 = vsel %vm157_vm7, %v154_v56, %v156_v59 }
  0xab   :  { %285 = vmatpush1.bf16.msra.mxu1 %v160_v61 }
  0xac   :  { %v170_v62 = vpop.permute.xlu0 %169  ;;  %286 = vmatprep.subr.bf16.mxu1 %v668_v1 }
  0xad   :  { %v172_v63 = vpop.permute.xlu1 %171 }
  0xae   :  { %v177_v0 = vsel %vm175_vm8, %v170_v62, %v172_v63 }
  0xaf   :  { %245 = vmatprep.subr.bf16.mxu0 %v177_v0 }
  0xb0   :  { %v168_v2 = vpop.permute.xlu0 %167 }
  0xb1   :  { %v174_v3 = vpop.permute.xlu1 %173  ;;  %v176_v4 = vsel %vm175_vm8, %v168_v2, %v170_v62  ;;  %v634_v62 = vcombine.low %v869_v10, %v869_v10 }
  0xb2   :  { %246 = vmatpush1.bf16.msra.mxu0 %v176_v4  ;;  %v178_v11 = vsel %vm175_vm8, %v172_v63, %v174_v3 }
  0xb3   :  { %287 = vmatpush1.bf16.msra.mxu1 %v178_v11  ;;  %524 = vmatprep.subr.bf16.mxu0 %v756_v7 }
  0xb4   :  { %v346_v12 = vpop.permute.xlu0 %345  ;;  %565 = vmatprep.subr.bf16.mxu1 %v668_v1 }
  0xb5   :  { %v348_v14 = vpop.permute.xlu1 %347  ;;  %262 = vmatmul.mubr.bf16.vlgmr.msra.gmra.mrb[0].mxu0 %v620_v6 }
  0xb6   :  { %303 = vmatmul.mubr.bf16.vlgmr.msra.gmra.mrb[0].mxu1 %v620_v6  ;;  %525 = vmatpush1.bf16.msra.mxu0 %v769_v9  ;;  %v352_v5 = vsel %vm49_vm1, %v346_v12, %v348_v14 }
  0xb7   :  { %566 = vmatpush1.bf16.msra.mxu1 %v762_v8  ;;  %526 = vmatprep.subr.bf16.mxu0 %v352_v5 }
  0xb8   :  { %v344_v15 = vpop.permute.xlu0 %343  ;;  %567 = vmatprep.subr.bf16.mxu1 %v668_v1  ;;  %636 = vmatprep.mubr.msk.bf16.mxu0 %vm225_vm0, %v635_v13 }
  0xb9   :  { %v351_v7 = vsel %vm49_vm1, %v344_v15, %v346_v12  ;;  %v350_v16 = vpop.permute.xlu1 %349  ;;  %637 = vmatprep.mubr.msk.bf16.mxu1 %vm225_vm0, %v635_v13 }
  0xba   :  { %v353_v17 = vsel %vm49_vm1, %v348_v14, %v350_v16  ;;  %527 = vmatpush1.bf16.msra.mxu0 %v351_v7 }
  0xbb   :  { %568 = vmatpush1.bf16.msra.mxu1 %v353_v17 }
  0xbc   :  { %v363_v9 = vpop.permute.xlu0 %362  ;;  %569 = vmatprep.subr.bf16.mxu1 %v668_v1 }
  0xbd   :  { %v365_v18 = vpop.permute.xlu1 %364 }
  0xbe   :  { %v369_v8 = vsel %vm67_vm2, %v363_v9, %v365_v18 }
  0xbf   :  { %528 = vmatprep.subr.bf16.mxu0 %v369_v8 }
  0xc0   :  { %v361_v19 = vpop.permute.xlu0 %360 }
  0xc1   :  { %v368_v20 = vsel %vm67_vm2, %v361_v19, %v363_v9  ;;  %v367_v21 = vpop.permute.xlu1 %366 }
  0xc2   :  { %v370_v22 = vsel %vm67_vm2, %v365_v18, %v367_v21  ;;  %529 = vmatpush1.bf16.msra.mxu0 %v368_v20 }
  0xc3   :  { %570 = vmatpush1.bf16.msra.mxu1 %v370_v22 }
  0xc4   :  { %v380_v23 = vpop.permute.xlu0 %379  ;;  %571 = vmatprep.subr.bf16.mxu1 %v668_v1 }
  0xc5   :  { %v382_v24 = vpop.permute.xlu1 %381 }
  0xc6   :  { %v386_v25 = vsel %vm85_vm3, %v380_v23, %v382_v24 }
  0xc7   :  { %530 = vmatprep.subr.bf16.mxu0 %v386_v25 }
  0xc8   :  { %v378_v26 = vpop.permute.xlu0 %377 }
  0xc9   :  { %v385_v27 = vsel %vm85_vm3, %v378_v26, %v380_v23  ;;  %v384_v28 = vpop.permute.xlu1 %383 }
  0xca   :  { %v387_v29 = vsel %vm85_vm3, %v382_v24, %v384_v28  ;;  %531 = vmatpush1.bf16.msra.mxu0 %v385_v27 }
  0xcb   :  { %572 = vmatpush1.bf16.msra.mxu1 %v387_v29 }
  0xcc   :  { %v397_v30 = vpop.permute.xlu0 %396  ;;  %573 = vmatprep.subr.bf16.mxu1 %v668_v1 }
  0xcd   :  { %v399_v31 = vpop.permute.xlu1 %398 }
  0xce   :  { %v403_v32 = vsel %vm103_vm4, %v397_v30, %v399_v31 }
  0xcf   :  { %532 = vmatprep.subr.bf16.mxu0 %v403_v32 }
  0xd0   :  { %v395_v33 = vpop.permute.xlu0 %394 }
  0xd1   :  { %v402_v34 = vsel %vm103_vm4, %v395_v33, %v397_v30  ;;  %v401_v35 = vpop.permute.xlu1 %400 }
  0xd2   :  { %v404_v36 = vsel %vm103_vm4, %v399_v31, %v401_v35  ;;  %533 = vmatpush1.bf16.msra.mxu0 %v402_v34 }
  0xd3   :  { %574 = vmatpush1.bf16.msra.mxu1 %v404_v36 }
  0xd4   :  { %v414_v37 = vpop.permute.xlu0 %413  ;;  %575 = vmatprep.subr.bf16.mxu1 %v668_v1 }
  0xd5   :  { %v416_v38 = vpop.permute.xlu1 %415 }
  0xd6   :  { %v420_v39 = vsel %vm121_vm5, %v414_v37, %v416_v38 }
  0xd7   :  { %534 = vmatprep.subr.bf16.mxu0 %v420_v39 }
  0xd8   :  { %v412_v40 = vpop.permute.xlu0 %411 }
  0xd9   :  { %v419_v41 = vsel %vm121_vm5, %v412_v40, %v414_v37  ;;  %v418_v42 = vpop.permute.xlu1 %417 }
  0xda   :  { %v421_v43 = vsel %vm121_vm5, %v416_v38, %v418_v42  ;;  %535 = vmatpush1.bf16.msra.mxu0 %v419_v41 }
  0xdb   :  { %576 = vmatpush1.bf16.msra.mxu1 %v421_v43 }
  0xdc   :  { %v431_v44 = vpop.permute.xlu0 %430  ;;  %577 = vmatprep.subr.bf16.mxu1 %v668_v1 }
  0xdd   :  { %v433_v45 = vpop.permute.xlu1 %432 }
  0xde   :  { %v437_v46 = vsel %vm139_vm6, %v431_v44, %v433_v45 }
  0xdf   :  { %536 = vmatprep.subr.bf16.mxu0 %v437_v46 }
  0xe0   :  { %v429_v47 = vpop.permute.xlu0 %428 }
  0xe1   :  { %v436_v48 = vsel %vm139_vm6, %v429_v47, %v431_v44  ;;  %v435_v49 = vpop.permute.xlu1 %434 }
  0xe2   :  { %v438_v50 = vsel %vm139_vm6, %v433_v45, %v435_v49  ;;  %537 = vmatpush1.bf16.msra.mxu0 %v436_v48 }
  0xe3   :  { %578 = vmatpush1.bf16.msra.mxu1 %v438_v50 }
  0xe4   :  { %v448_v51 = vpop.permute.xlu0 %447  ;;  %579 = vmatprep.subr.bf16.mxu1 %v668_v1 }
  0xe5   :  { %v450_v52 = vpop.permute.xlu1 %449 }
  0xe6   :  { %v454_v53 = vsel %vm157_vm7, %v448_v51, %v450_v52 }
  0xe7   :  { %538 = vmatprep.subr.bf16.mxu0 %v454_v53 }
  0xe8   :  { %v446_v54 = vpop.permute.xlu0 %445 }
  0xe9   :  { %v453_v55 = vsel %vm157_vm7, %v446_v54, %v448_v51  ;;  %v452_v56 = vpop.permute.xlu1 %451 }
  0xea   :  { %v455_v57 = vsel %vm157_vm7, %v450_v52, %v452_v56  ;;  %539 = vmatpush1.bf16.msra.mxu0 %v453_v55 }
  0xeb   :  { %580 = vmatpush1.bf16.msra.mxu1 %v455_v57 }
  0xec   :  { %v465_v58 = vpop.permute.xlu0 %464  ;;  %581 = vmatprep.subr.bf16.mxu1 %v668_v1 }
  0xed   :  { %v467_v59 = vpop.permute.xlu1 %466 }
  0xee   :  { %v471_v60 = vsel %vm175_vm8, %v465_v58, %v467_v59 }
  0xef   :  { %540 = vmatprep.subr.bf16.mxu0 %v471_v60 }
  0xf0   :  { %v463_v61 = vpop.permute.xlu0 %462 }
  0xf1   :  { %v470_v63 = vsel %vm175_vm8, %v463_v61, %v465_v58  ;;  %v469_v0 = vpop.permute.xlu1 %468 }
  0xf2   :  { %v472_v2 = vsel %vm175_vm8, %v467_v59, %v469_v0  ;;  %541 = vmatpush1.bf16.msra.mxu0 %v470_v63 }
  0xf3   :  { %582 = vmatpush1.bf16.msra.mxu1 %v472_v2 }
  0xf5   :  { %557 = vmatmul.mubr.bf16.vlgmr.msra.gmra.mrb[4].mxu0 %v634_v62 }
  0xf6   :  { %598 = vmatmul.mubr.bf16.vlgmr.msra.gmra.mrb[4].mxu1 %v634_v62 }
 0x101   :  { %v217_v3 = vpop.permute.xlu0 %216 }
 0x102   :  { %v513_v18 = vpop.permute.xlu1 %512 }
 0x188   :  { %v263_v4 = vpop.f32.mrb[0].mxu0 }
 0x189   :  { %v265_v1 = vpop.f32.mrb[1].mxu0  ;;  %v304_v6 = vpop.f32.mrb[0].mxu1  ;;  %v264_v11 = vadd.f32 %v263_v4, %v217_v3 }
 0x18a   :  { %v267_v12 = vpop.f32.mrb[2].mxu0  ;;  %v306_v13 = vpop.f32.mrb[1].mxu1  ;;  %v266_v14 = vadd.f32 %v265_v1, %v217_v3  ;;  %v305_v5 = vadd.f32 %v304_v6, %v217_v3 }
 0x18b   :  { %v310_v15 = vmax.f32 %v264_v11, 0.0  ;;  %v268_v10 = vpop.f32.mrb[3].mxu0  ;;  %v307_v7 = vpop.f32.mrb[2].mxu1 }
 0x18c   :  { %v311_v16 = vmax.f32 %v266_v14, 0.0  ;;  %v312_v17 = vmax.f32 %v305_v5, 0.0  ;;  %v308_v9 = vpop.f32.mrb[3].mxu1 }
 0x18d   :  { %313 = vst [vmem:[%s935_s3] sm:$0xff] %v310_v15 }
 0x18e   :  { %314 = vst [vmem:[%s935_s3 + $0x8] sm:$0xff] %v311_v16  ;;  %315 = vst [vmem:[%s935_s3 + $0x10] sm:$0xff] %v312_v17 }
 0x1c8   :  { %v558_v8 = vpop.f32.mrb[4].mxu0 }
 0x1c9   :  { %v599_v19 = vpop.f32.mrb[4].mxu1  ;;  %v559_v20 = vadd.f32 %v558_v8, %v513_v18  ;;  %v560_v21 = vpop.f32.mrb[5].mxu0 }
 0x1ca   :  { %v600_v22 = vadd.f32 %v599_v19, %v513_v18  ;;  %v561_v23 = vadd.f32 %v560_v21, %v513_v18  ;;  %v601_v24 = vpop.f32.mrb[5].mxu1  ;;  %v562_v25 = vpop.f32.mrb[6].mxu0 }
 0x1cb   :  { %v605_v26 = vmax.f32 %v559_v20, 0.0  ;;  %v602_v27 = vpop.f32.mrb[6].mxu1  ;;  %v563_v28 = vpop.f32.mrb[7].mxu0 }
 0x1cc   :  { %v607_v29 = vmax.f32 %v600_v22, 0.0  ;;  %v606_v30 = vmax.f32 %v561_v23, 0.0  ;;  %v603_v31 = vpop.f32.mrb[7].mxu1 }
 0x1cd   :  { %638 = vst [vmem:[%s935_s3 + $0x18] sm:$0xff] %v605_v26 }
 0x1ce   :  { %640 = vst [vmem:[%s935_s3 + $0x28] sm:$0xff] %v607_v29  ;;  %639 = vst [vmem:[%s935_s3 + $0x20] sm:$0xff] %v606_v30 }

</bundles_post_ra>
